<compile_context>
chip_gen: v5e
topology: v5e:2x2
jax: 0.10.0
libtpu: 0.0.40
codegen_flags: <defaults>
</compile_context>

<pallas_src>
import functools

import numpy as np

import jax
import jax.numpy as jnp
from jax.experimental import pallas as pl
from jax.experimental.pallas import tpu as pltpu


def _make_kernel(NB, C_in, C_out, KH, KW, H, W, pad_h, pad_w, skip_mask):
    """Build a causal-conv kernel specialized to static shapes."""
    M = H * W                       # flat spatial length (lane dim)
    Kc = KH * KW * C_in             # contraction length of the fused matmul

    # Tap (kh, kw): output flat position q needs input flat position q + off
    # (when in bounds); realized as a roll by (-off) mod M + a boundary mask.
    offs = [(kh - pad_h) * W + (kw - pad_w)
            for kh in range(KH) for kw in range(KW)]
    shifts = [(-o) % M for o in offs]

    def kernel(x_ref, w_ref, m_ref, b_ref, o_ref):
        # x_ref: (NB, C_in, M)        lane-dense flat NCHW batch chunk
        # w_ref: (C_out, Kc)          flattened weights, row order (kh, kw, cin)
        # m_ref: (KH*KW, 1, M)        per-tap zero-padding masks (0./1.)
        # b_ref: (C_out, 1)           bias
        # o_ref: (NB, C_out, M)       lane-dense output (last dim = M)
        w = w_ref[...]
        bias = b_ref[...]

        per_image_cols = []
        for b in range(NB):                      # static unroll, NB is small
            xb = x_ref[b]                        # (C_in, M) lane-dense slab
            taps = []
            for k, shift in enumerate(shifts):   # static unroll, KH*KW taps
                # XLU lane rotation — no slice/reshape relayouts.
                r = xb if shift == 0 else pltpu.roll(xb, shift, axis=1)
                if not skip_mask[k]:
                    r = r * m_ref[k]             # (C_in, M) * (1, M) broadcast
                taps.append(r)
            # Sublane-direction stack of lane-dense taps -> (Kc, M).
            per_image_cols.append(jnp.concatenate(taps, axis=0))

        # Patches for all NB images side by side along M (lane-aligned when
        # M % 128 == 0), then ONE MXU matmul for the whole grid step.
        patches = (per_image_cols[0] if NB == 1
                   else jnp.concatenate(per_image_cols, axis=1))   # (Kc, NB*M)
        acc = jnp.dot(w, patches,
                      preferred_element_type=jnp.float32) + bias   # (C_out, NB*M)

        # Per-image stores with lane-aligned slices (unmasked vst when M%128==0).
        for b in range(NB):
            o_ref[b] = acc[:, b * M:(b + 1) * M].astype(o_ref.dtype)

    return kernel


@functools.partial(jax.jit,
                   static_argnames=("pad_w", "pad_h", "stride", "dilation", "groups"))
def causal_conv2d(x_nchw, weight_oihw, bias, *, pad_w, pad_h,
                  stride=(1, 1), dilation=(1, 1), groups=1):
    """Pallas implementation of causalConv2d.forward.

    x_nchw:      (N, C_in, H, W)        float32 (PyTorch NCHW layout, unchanged)
    weight_oihw: (C_out, C_in, KH, KW)  float32 (PyTorch layout)
    bias:        (C_out,)               float32
    Returns:     (N, C_out, H_out, W_out)
    """
    if tuple(stride) != (1, 1) or tuple(dilation) != (1, 1) or groups != 1:
        raise NotImplementedError(
            "causal_conv2d Pallas kernel supports stride=1, dilation=1, groups=1 only")

    N, C_in, H, W = x_nchw.shape
    C_out, C_in_w, KH, KW = weight_oihw.shape
    assert C_in_w == C_in, (C_in_w, C_in)

    H_out = H + 2 * pad_h - KH + 1
    W_out = W + pad_w - KW + 1
    if not (0 < H_out <= H and 0 < W_out <= W):
        raise NotImplementedError(
            "flat-roll formulation requires 0 < H_out <= H and 0 < W_out <= W")

    M = H * W
    K = KH * KW
    Kc = K * C_in

    # Lane-dense inputs: pure reshapes, no transpose, no XLA pad.
    x_flat = x_nchw.reshape(N, C_in, M)
    # (C_out, KH, KW, C_in) -> (C_out, Kc), matching the kernel's (kh, kw, cin)
    # patch-row ordering.
    w2 = jnp.transpose(weight_oihw, (0, 2, 3, 1)).reshape(C_out, Kc)
    b2 = bias.reshape(C_out, 1)

    # Per-tap boundary masks (implement the causal/symmetric zero padding).
    # Static shapes -> plain numpy -> baked-in constant.
    hh, ww = np.meshgrid(np.arange(H), np.arange(W), indexing="ij")
    masks_np = np.zeros((K, 1, M), np.float32)
    tap_list = [(kh, kw) for kh in range(KH) for kw in range(KW)]
    for k, (kh, kw) in enumerate(tap_list):
        hin = hh + kh - pad_h
        win = ww + kw - pad_w
        ok = (hin >= 0) & (hin < H) & (win >= 0) & (win < W)
        masks_np[k, 0] = ok.reshape(M).astype(np.float32)
    skip_mask = tuple(bool(np.all(masks_np[k] == 1.0)) for k in range(K))
    masks = jnp.asarray(masks_np)

    # Batch chunk per grid step.  Keep >= min(N, 4) grid steps so (a) the
    # Pallas pipeline can overlap DMA with compute and (b) the "parallel"
    # batch axis can shard across v7x's two TensorCores; within that budget
    # pick the largest divisor of N to amortize the ~0.35 us/step overhead on
    # single-TC v5e/v6e.  Prime N > 4 degrades to NB=1 (grid=N): correct,
    # just more per-step overhead.
    min_steps = min(N, 4)
    NB = 1
    for cand in range(N, 0, -1):
        if N % cand == 0 and N // cand >= min_steps:
            NB = cand
            break
    grid = (N // NB,)

    kernel = _make_kernel(NB, C_in, C_out, KH, KW, H, W, pad_h, pad_w, skip_mask)

    flops = 2 * N * C_out * Kc * M
    bytes_accessed = 4 * (x_flat.size + w2.size + masks.size + b2.size
                          + N * C_out * M)

    out_flat = pl.pallas_call(
        kernel,
        out_shape=jax.ShapeDtypeStruct((N, C_out, M), x_nchw.dtype),
        grid_spec=pltpu.PrefetchScalarGridSpec(
            num_scalar_prefetch=0,
            grid=grid,
            in_specs=[
                pl.BlockSpec((NB, C_in, M), lambda n: (n, 0, 0)),
                pl.BlockSpec((C_out, Kc), lambda n: (0, 0)),
                pl.BlockSpec((K, 1, M), lambda n: (0, 0, 0)),
                pl.BlockSpec((C_out, 1), lambda n: (0, 0)),
            ],
            out_specs=pl.BlockSpec((NB, C_out, M), lambda n: (n, 0, 0)),
        ),
        compiler_params=pltpu.CompilerParams(
            dimension_semantics=("parallel",)),
        cost_estimate=pl.CostEstimate(
            flops=flops, transcendentals=0, bytes_accessed=bytes_accessed),
    )(x_flat, w2, masks, b2)

    # Pure reshape back to NCHW; slice only if the conv shrinks the frame
    # (no-op for the standard causalConv2d configs where H_out=H, W_out=W).
    out = out_flat.reshape(N, C_out, H, W)
    if H_out != H or W_out != W:
        out = out[:, :, :H_out, :W_out]
    return out


def _reference(x_nchw, weight_oihw, bias, pad_w, pad_h):
    """Pure-JAX reference matching PyTorch causalConv2d semantics."""
    x = jnp.pad(x_nchw, ((0, 0), (0, 0), (pad_h, pad_h), (pad_w, 0)))
    out = jax.lax.conv_general_dilated(
        x, weight_oihw,
        window_strides=(1, 1),
        padding="VALID",
        dimension_numbers=("NCHW", "OIHW", "NCHW"),
    )
    return out + bias[None, :, None, None]


if __name__ == "__main__":
    # Config used by MLFEe5's SPCONV / dilatedDenseBlock in-and-out layers:
    #   causalConv2d(in_ch, out_ch, kernel_size=(3, 2), padding=(1, 1))
    #   -> symmetric H pad = padding[1] = 1, causal (left) W pad = padding[0] = 1
    N, C_in, H, W = 2, 4, 16, 16
    C_out, KH, KW = 8, 3, 2
    pad_w, pad_h = 1, 1

    key = jax.random.PRNGKey(0)
    kx, kw_, kb = jax.random.split(key, 3)
    x = jax.random.normal(kx, (N, C_in, H, W), dtype=jnp.float32)
    # Deterministic param init (Conv2d-like uniform fan-in scaling).
    fan_in = C_in * KH * KW
    bound = 1.0 / (fan_in ** 0.5)
    weight = jax.random.uniform(kw_, (C_out, C_in, KH, KW),
                                minval=-bound, maxval=bound, dtype=jnp.float32)
    bias = jax.random.uniform(kb, (C_out,), minval=-bound, maxval=bound,
                              dtype=jnp.float32)

    out = causal_conv2d(x, weight, bias, pad_w=pad_w, pad_h=pad_h)
    out = jax.block_until_ready(out)

    ref = _reference(x, weight, bias, pad_w, pad_h)
    assert out.shape == ref.shape, (out.shape, ref.shape)
    # 1e-4 tolerance covers the TPU default matmul precision of the in-kernel
    # f32 dot (contraction length is only KH*KW*C_in = 24).
    assert jnp.allclose(out, ref, atol=1e-4, rtol=1e-4), \
        float(jnp.max(jnp.abs(out - ref)))

    print("KERNEL_OK")
</pallas_src>

<mosaic_0001>
module attributes {stable_mosaic.version = 11 : i64} {
  func.func @kernel(%arg0: i32, %arg1: memref<1x4x256xf32, #tpu.memory_space<vmem>>, %arg2: memref<8x24xf32, #tpu.memory_space<vmem>>, %arg3: memref<6x1x256xf32, #tpu.memory_space<vmem>>, %arg4: memref<8x1xf32, #tpu.memory_space<vmem>>, %arg5: memref<1x8x256xf32, #tpu.memory_space<vmem>>) attributes {dimension_semantics = [#tpu.dimension_semantics<parallel>], iteration_bounds = array<i64: 2>, scalar_prefetch = 0 : i64, scratch_operands = 0 : i64, tpu.core_type = #tpu.core_type<tc>, window_params = [{transform_indices = @transform_0, window_bounds = array<i64: 1, 4, 256>}, {pipeline_mode = #tpu.pipeline_mode<synchronous>, transform_indices = @transform_1, window_bounds = array<i64: 8, 24>}, {pipeline_mode = #tpu.pipeline_mode<synchronous>, transform_indices = @transform_2, window_bounds = array<i64: 6, 1, 256>}, {pipeline_mode = #tpu.pipeline_mode<synchronous>, transform_indices = @transform_3, window_bounds = array<i64: 8, 1>}, {transform_indices = @transform_4, window_bounds = array<i64: 1, 8, 256>}]} {
    %c0 = arith.constant 0 : index
    %c0_0 = arith.constant 0 : index
    %0 = vector.load %arg2[%c0, %c0_0] : memref<8x24xf32, #tpu.memory_space<vmem>>, vector<8x24xf32>
    %c0_1 = arith.constant 0 : index
    %c0_2 = arith.constant 0 : index
    %1 = vector.load %arg4[%c0_1, %c0_2] : memref<8x1xf32, #tpu.memory_space<vmem>>, vector<8x1xf32>
    %c0_3 = arith.constant 0 : index
    %c0_4 = arith.constant 0 : index
    %c0_5 = arith.constant 0 : index
    %2 = vector.load %arg1[%c0_3, %c0_4, %c0_5] : memref<1x4x256xf32, #tpu.memory_space<vmem>>, vector<1x4x256xf32>
    %3 = vector.shape_cast %2 : vector<1x4x256xf32> to vector<4x256xf32>
    %c17_i32 = arith.constant 17 : i32
    %4 = tpu.dynamic_rotate %3 by %c17_i32 dim 1 : vector<4x256xf32>, i32 -> vector<4x256xf32>
    %c0_6 = arith.constant 0 : index
    %c0_7 = arith.constant 0 : index
    %c0_8 = arith.constant 0 : index
    %5 = vector.load %arg3[%c0_6, %c0_7, %c0_8] : memref<6x1x256xf32, #tpu.memory_space<vmem>>, vector<1x1x256xf32>
    %6 = vector.shape_cast %5 : vector<1x1x256xf32> to vector<1x256xf32>
    %7 = vector.broadcast %6 : vector<1x256xf32> to vector<4x256xf32>
    %8 = arith.mulf %4, %7 : vector<4x256xf32>
    %c16_i32 = arith.constant 16 : i32
    %9 = tpu.dynamic_rotate %3 by %c16_i32 dim 1 : vector<4x256xf32>, i32 -> vector<4x256xf32>
    %c1 = arith.constant 1 : index
    %c0_9 = arith.constant 0 : index
    %c0_10 = arith.constant 0 : index
    %10 = vector.load %arg3[%c1, %c0_9, %c0_10] : memref<6x1x256xf32, #tpu.memory_space<vmem>>, vector<1x1x256xf32>
    %11 = vector.shape_cast %10 : vector<1x1x256xf32> to vector<1x256xf32>
    %12 = vector.broadcast %11 : vector<1x256xf32> to vector<4x256xf32>
    %13 = arith.mulf %9, %12 : vector<4x256xf32>
    %c1_i32 = arith.constant 1 : i32
    %14 = tpu.dynamic_rotate %3 by %c1_i32 dim 1 : vector<4x256xf32>, i32 -> vector<4x256xf32>
    %c2 = arith.constant 2 : index
    %c0_11 = arith.constant 0 : index
    %c0_12 = arith.constant 0 : index
    %15 = vector.load %arg3[%c2, %c0_11, %c0_12] : memref<6x1x256xf32, #tpu.memory_space<vmem>>, vector<1x1x256xf32>
    %16 = vector.shape_cast %15 : vector<1x1x256xf32> to vector<1x256xf32>
    %17 = vector.broadcast %16 : vector<1x256xf32> to vector<4x256xf32>
    %18 = arith.mulf %14, %17 : vector<4x256xf32>
    %c241_i32 = arith.constant 241 : i32
    %19 = tpu.dynamic_rotate %3 by %c241_i32 dim 1 : vector<4x256xf32>, i32 -> vector<4x256xf32>
    %c4 = arith.constant 4 : index
    %c0_13 = arith.constant 0 : index
    %c0_14 = arith.constant 0 : index
    %20 = vector.load %arg3[%c4, %c0_13, %c0_14] : memref<6x1x256xf32, #tpu.memory_space<vmem>>, vector<1x1x256xf32>
    %21 = vector.shape_cast %20 : vector<1x1x256xf32> to vector<1x256xf32>
    %22 = vector.broadcast %21 : vector<1x256xf32> to vector<4x256xf32>
    %23 = arith.mulf %19, %22 : vector<4x256xf32>
    %c240_i32 = arith.constant 240 : i32
    %24 = tpu.dynamic_rotate %3 by %c240_i32 dim 1 : vector<4x256xf32>, i32 -> vector<4x256xf32>
    %c5 = arith.constant 5 : index
    %c0_15 = arith.constant 0 : index
    %c0_16 = arith.constant 0 : index
    %25 = vector.load %arg3[%c5, %c0_15, %c0_16] : memref<6x1x256xf32, #tpu.memory_space<vmem>>, vector<1x1x256xf32>
    %26 = vector.shape_cast %25 : vector<1x1x256xf32> to vector<1x256xf32>
    %27 = vector.broadcast %26 : vector<1x256xf32> to vector<4x256xf32>
    %28 = arith.mulf %24, %27 : vector<4x256xf32>
    %29 = tpu.concatenate %8, %13, %18, %3, %23, %28 in 0 : vector<4x256xf32>, vector<4x256xf32>, vector<4x256xf32>, vector<4x256xf32>, vector<4x256xf32>, vector<4x256xf32> -> vector<24x256xf32>
    %cst = arith.constant dense<0.000000e+00> : vector<8x256xf32>
    %30 = tpu.matmul %0, %29, %cst {dimension_numbers = #tpu.dot_dimension_numbers<[1], [0], [0], [1], [0, 0, 1, 1], [], []>} : vector<8x24xf32>, vector<24x256xf32>, vector<8x256xf32> -> vector<8x256xf32>
    %31 = vector.broadcast %1 : vector<8x1xf32> to vector<8x256xf32>
    %32 = arith.addf %30, %31 : vector<8x256xf32>
    %c0_17 = arith.constant 0 : index
    %c0_18 = arith.constant 0 : index
    %c0_19 = arith.constant 0 : index
    %33 = vector.load %arg5[%c0_17, %c0_18, %c0_19] : memref<1x8x256xf32, #tpu.memory_space<vmem>>, vector<1x8x256xf32>
    %34 = vector.shape_cast %33 : vector<1x8x256xf32> to vector<8x256xf32>
    %35 = vector.shape_cast %32 : vector<8x256xf32> to vector<1x8x256xf32>
    tpu.vector_store %arg5[%c0_17, %c0_18, %c0_19], %35 {strides = array<i32>} : memref<1x8x256xf32, #tpu.memory_space<vmem>>, vector<1x8x256xf32>,
    return
  }
  func.func @transform_0(%arg0: i32) -> (i32, i32, i32) {
    %c0_i32 = arith.constant 0 : i32
    %c0_i32_0 = arith.constant 0 : i32
    %c0_i32_1 = arith.constant 0 : i32
    return %arg0, %c0_i32, %c0_i32_0 : i32, i32, i32
  }
  func.func @transform_1(%arg0: i32) -> (i32, i32) {
    %c0_i32 = arith.constant 0 : i32
    %c0_i32_0 = arith.constant 0 : i32
    %c0_i32_1 = arith.constant 0 : i32
    return %c0_i32, %c0_i32_0 : i32, i32
  }
  func.func @transform_2(%arg0: i32) -> (i32, i32, i32) {
    %c0_i32 = arith.constant 0 : i32
    %c0_i32_0 = arith.constant 0 : i32
    %c0_i32_1 = arith.constant 0 : i32
    %c0_i32_2 = arith.constant 0 : i32
    return %c0_i32, %c0_i32_0, %c0_i32_1 : i32, i32, i32
  }
  func.func @transform_3(%arg0: i32) -> (i32, i32) {
    %c0_i32 = arith.constant 0 : i32
    %c0_i32_0 = arith.constant 0 : i32
    %c0_i32_1 = arith.constant 0 : i32
    return %c0_i32, %c0_i32_0 : i32, i32
  }
  func.func @transform_4(%arg0: i32) -> (i32, i32, i32) {
    %c0_i32 = arith.constant 0 : i32
    %c0_i32_0 = arith.constant 0 : i32
    %c0_i32_1 = arith.constant 0 : i32
    return %arg0, %c0_i32, %c0_i32_0 : i32, i32, i32
  }
}

</mosaic_0001>

<bundles_post_ra>
// kernel: causal_conv2d.1
= control target key start
LH: loop header
LB: loop body
LE: loop exit
PB: predicated region body
PF: predicated region fallthrough
CT: control target
= control target key end

     0   :  { %s513_s15 = smov 0   ;;  %s563_s0 = inlined_call_operand.vmem [shape: f32[2,4,256], index: 0, kind: input, shape index: {}]   ;;  %s564_s1 = inlined_call_operand.vmem [shape: f32[8,24], index: 1, kind: input, shape index: {}]   ;;  %s565_s2 = inlined_call_operand.vmem [shape: f32[6,1,256], index: 2, kind: input, shape index: {}]   ;;  %s566_s3 = inlined_call_operand.vmem [shape: f32[8,1], index: 3, kind: input, shape index: {}]   ;;  %s567_s4 = inlined_call_operand.vmem [shape: f32[2,8,256], index: 4, kind: output, shape index: {}]  }
   0x1 LB: > { %s439_s16 = sadd.s32 4294967295, %s480_s15   ;;  %p443_p0 = scmp.ge.s32.totalorder %s480_s15, 1  ;;  %s480_s15 = sphi %s513_s15, %s14_s15  }
   0x2   : > { %p162_p1 = scmp.lt.s32.totalorder %s480_s15, 3 }
   0x4   : > { %p163_p2 = pnand %p443_p0, %p162_p1 }
   0x5   : > { %p188_p3 = scmp.lt.s32.totalorder (!%p163_p2), %s439_s16, 1  ;;  %s482_s21 = smov (!%p163_p2), 16  }
   0x6   : > { %166 = sbr.rel (%p163_p2) target bundleno = 321 (0x141), region = 36  ;;  %s483_s22 = smov (!%p163_p2), 1  }
   0x7   : > { %s484_s23 = smov (!%p163_p2), 113   ;;  %s485_s24 = smov (!%p163_p2), 17  }
   0x8   : > { %s486_s25 = smov (!%p163_p2), 112  }
   0xb   : > { %s569_s16 = smov (!%p188_p3, %s439_s16), 1  ;;  %v199_v12 = vld [vmem:[%s566_s3] sm:$0xff]  ;;  %v487_v13 = vmov 0   ;;  %v211_v16 = vlaneseq  ;;  %v451_v21 = vld [vmem:[%s565_s2 + $0xa] sm:$0x3]  ;;  %vm326_vm4 = vcmask 1043456  }
   0xc   : > { %s456_s17 = sshll.u32 %s569_s16, 3  ;;  %472 = vset.pattern.permute.xlu1 %v487_v13  ;;  %473 = vset.pattern.permute.xlu0 %v487_v13  ;;  %v448_v20 = vld [vmem:[%s565_s2 + $0x2] sm:$0x3]  ;;  %v450_v22 = vld [vmem:[%s565_s2 + $0x8] sm:$0x3]  ;;  %v302_v26 = vperm.slane %v451_v21, 0 }
   0xd   : > { %s192_s20 = scalar_lea.vmem %s563_s0, %s456_s17  ;;  %v212_v19 = vand.u32 127, %v211_v16  ;;  %v239_v23 = vperm.slane %v448_v20, 0  ;;  %v449_v24 = vld [vmem:[%s565_s2 + $0x4] sm:$0x3]  ;;  %v303_v27 = vperm.slane %v451_v21, 1  ;;  %v240_v28 = vperm.slane %v448_v20, 1 }
   0xe   : > { %v200_v0 = vld [vmem:[%s192_s20] sm:$0xff]  ;;  %v281_v29 = vperm.slane %v450_v22, 0  ;;  %v282_v30 = vperm.slane %v450_v22, 1  ;;  %v260_v33 = vperm.slane %v449_v24, 0  ;;  %v261_v34 = vperm.slane %v449_v24, 1  ;;  %s457_s14 = sshll.u32 %s569_s16, 4 }
   0xf   : > { %202 = vst [vmem:[#allocation1] ss:$2 sm:$0xff] %v200_v0  ;;  %vm275_vm0 = vcmp.lt.s32.totalorder %v212_v19, 113  ;;  %vm254_vm1 = vcmp.lt.s32.totalorder %v212_v19, 1  ;;  %vm296_vm2 = vcmp.lt.s32.totalorder %v212_v19, 112  ;;  %vm233_vm3 = vcmp.lt.s32.totalorder %v212_v19, 16  ;;  %s197_s19 = scalar_lea.vmem %s567_s4, %s457_s14 }
  0x10   : > { %v216_v47 = vld [vmem:[%s565_s2] sm:$0x3]  ;;  %vm213_vm5 = vcmp.lt.s32.totalorder %v212_v19, 17  ;;  %vm338_vm6 = vcmask 195584  }
  0x11   : > { %v218_v59 = vperm.slane %v216_v47, 0  ;;  %v219_v60 = vperm.slane %v216_v47, 1 }
  0x16   : > { %v203_v1 = vld.sshfl [vmem:[#allocation1] sm:$0xff pattern:$0x75316420]  ;;  %v204_v2 = vld.sshfl [vmem:[#allocation1 + $0x8] sm:$0xff pattern:$0x75316420] }
  0x17   : > { %224 = vst [vmem:[#allocation1] ss:$2 sm:$0xff] %v200_v0 }
  0x1e   : > { %v225_v3 = vld.sshfl [vmem:[#allocation1] sm:$0xff pattern:$0x75316420]  ;;  %v226_v4 = vld.sshfl [vmem:[#allocation1 + $0x8] sm:$0xff pattern:$0x75316420] }
  0x1f   : > { %245 = vst [vmem:[#allocation1] ss:$2 sm:$0xff] %v200_v0  ;;  %229 = vrot.lane.b32.xlu2 %v225_v3, %s482_s21 }
  0x26   : > { %v246_v5 = vld.sshfl [vmem:[#allocation1] sm:$0xff pattern:$0x75316420]  ;;  %v247_v6 = vld.sshfl [vmem:[#allocation1 + $0x8] sm:$0xff pattern:$0x75316420] }
  0x27   : > { %250 = vrot.lane.b32.xlu0 %v246_v5, %s483_s22  ;;  %266 = vst [vmem:[#allocation1] ss:$2 sm:$0xff] %v200_v0  ;;  %231 = vrot.lane.b32.xlu2 %v226_v4, %s482_s21 }
  0x2e   : > { %v267_v7 = vld.sshfl [vmem:[#allocation1] sm:$0xff pattern:$0x75316420]  ;;  %v268_v8 = vld.sshfl [vmem:[#allocation1 + $0x8] sm:$0xff pattern:$0x75316420] }
  0x2f   : > { %271 = vrot.lane.b32.xlu1 %v267_v7, %s484_s23  ;;  %287 = vst [vmem:[#allocation1] ss:$2 sm:$0xff] %v200_v0  ;;  %207 = vrot.lane.b32.xlu2 %v203_v1, %s485_s24 }
  0x36   : > { %v288_v9 = vld.sshfl [vmem:[#allocation1] sm:$0xff pattern:$0x75316420]  ;;  %v289_v10 = vld.sshfl [vmem:[#allocation1 + $0x8] sm:$0xff pattern:$0x75316420] }
  0x37   : > { %273 = vrot.lane.b32.xlu1 %v268_v8, %s484_s23  ;;  %292 = vrot.lane.b32.xlu0 %v288_v9, %s486_s25  ;;  %315 = vst [vmem:[#allocation1 + $0x1] ss:$2 sm:$0xff] %v200_v0 }
  0x3e   : > { %v316_v52 = vld.sshfl [vmem:[#allocation1] sm:$0xff pattern:$0x75316420]  ;;  %v317_v55 = vld.sshfl [vmem:[#allocation1 + $0x8] sm:$0xff pattern:$0x75316420] }
  0x3f   : > { %252 = vrot.lane.b32.xlu1 %v247_v6, %s483_s22  ;;  %294 = vrot.lane.b32.xlu0 %v289_v10, %s486_s25  ;;  %v198_v6 = vld [vmem:[%s564_s1] sm:$0xff] }
  0x47   : > { %209 = vrot.lane.b32.xlu0 %v204_v2, %s485_s24  ;;  %335 = vperm.xlu1 %472, %v199_v12  }
  0x79   : > { %v230_v15 = vpop.permute.xlu2 %229 }
  0x81   : > { %v232_v25 = vpop.permute.xlu2 %231 }
  0x82   : > { %v234_v41 = vsel %vm233_vm3, %v230_v15, %v232_v25  ;;  %v235_v42 = vsel %vm233_vm3, %v232_v25, %v230_v15 }
  0x83   : > { %v243_v53 = vmul.f32 %v239_v23, %v235_v42  ;;  %v244_v54 = vmul.f32 %v240_v28, %v234_v41 }
  0x85   : > { %v310_v2 = vrot.slane %v243_v53, 4  ;;  %v311_v3 = vrot.slane %v244_v54, 4 }
  0x89   : > { %v208_v58 = vpop.permute.xlu2 %207 }
  0x99   : > { %v251_v11 = vpop.permute.xlu0 %250 }
  0xa1   : > { %v272_v14 = vpop.permute.xlu1 %271 }
  0xa9   : > { %v274_v17 = vpop.permute.xlu1 %273  ;;  %v293_v18 = vpop.permute.xlu0 %292 }
  0xaa   : > { %v276_v31 = vsel %vm275_vm0, %v272_v14, %v274_v17  ;;  %v277_v32 = vsel %vm275_vm0, %v274_v17, %v272_v14 }
  0xab   : > { %v285_v45 = vmul.f32 %v281_v29, %v276_v31  ;;  %v286_v46 = vmul.f32 %v282_v30, %v277_v32 }
  0xb1   : > { %v253_v35 = vpop.permute.xlu1 %252  ;;  %v295_v36 = vpop.permute.xlu0 %294 }
  0xb2   : > { %v255_v37 = vsel %vm254_vm1, %v251_v11, %v253_v35  ;;  %v256_v38 = vsel %vm254_vm1, %v253_v35, %v251_v11  ;;  %v297_v39 = vsel %vm296_vm2, %v293_v18, %v295_v36  ;;  %v298_v40 = vsel %vm296_vm2, %v295_v36, %v293_v18 }
  0xb3   : > { %v306_v43 = vmul.f32 %v302_v26, %v297_v39  ;;  %v307_v44 = vmul.f32 %v303_v27, %v298_v40  ;;  %v264_v48 = vmul.f32 %v260_v33, %v256_v38  ;;  %v265_v49 = vmul.f32 %v261_v34, %v255_v37 }
  0xb5   : > { %v322_v50 = vrot.slane %v306_v43, 4  ;;  %v323_v51 = vrot.slane %v307_v44, 4  ;;  %v329_v62 = vsel %vm326_vm4, %v264_v48, %v316_v52  ;;  %v330_v63 = vsel %vm326_vm4, %v265_v49, %v317_v55 }
  0xb7   : > { %v331_v56 = vsel %vm326_vm4, %v285_v45, %v322_v50  ;;  %v332_v57 = vsel %vm326_vm4, %v286_v46, %v323_v51 }
  0xb8   : > { %355 = vmatpush.msra.mxu0 %v331_v56  ;;  %375 = vmatpush.msra.mxu1 %v332_v57 }
  0xb9   : > { %v210_v61 = vpop.permute.xlu0 %209  ;;  %v336_v9 = vpop.permute.xlu1 %335 }
  0xba   : > { %v214_v0 = vsel %vm213_vm5, %v208_v58, %v210_v61  ;;  %v215_v1 = vsel %vm213_vm5, %v210_v61, %v208_v58  ;;  %356 = vmatpush.msra.mxu0 %v329_v62  ;;  %376 = vmatpush.msra.mxu1 %v330_v63 }
  0xbb   : > { %v222_v4 = vmul.f32 %v218_v59, %v215_v1  ;;  %v223_v5 = vmul.f32 %v219_v60, %v214_v0 }
  0xbd   : > { %v327_v7 = vsel %vm326_vm4, %v222_v4, %v310_v2  ;;  %v328_v8 = vsel %vm326_vm4, %v223_v5, %v311_v3 }
  0xbe   : > { %357 = vmatpush.msra.mxu0 %v327_v7  ;;  %377 = vmatpush.msra.mxu1 %v328_v8 }
  0xbf   : > { %452 = vmatmul.msk.f32.vlgmr.msra.gmra.mxu0 %vm338_vm6, %v198_v6  ;;  %453 = vmatmul.msk.f32.vlgmr.msra.gmra.mxu1 %vm338_vm6, %v198_v6 }
 0x13c   : > { %v359_v10 = vpop.f32.mrf.mxu0  ;;  %v379_v11 = vpop.f32.mrf.mxu1 }
 0x13d   : > { %v360_v12 = vadd.f32 %v359_v10, %v336_v9  ;;  %v380_v13 = vadd.f32 %v379_v11, %v336_v9 }
 0x13f   : > { %382 = vst [vmem:[%s197_s19] sm:$0xff] %v360_v12 }
 0x140   : > { %383 = vst [vmem:[%s197_s19 + $0x8] sm:$0xff] %v380_v13 }
 0x141 PF: > { %s14_s15 = sadd.s32 1, %s480_s15  }
 0x142   : > { %p11_p4 = scmp.ge.s32.totalorder %s14_s15, 4  }
 0x144   :  { %13 = sbr.rel (!%p11_p4) target bundleno = 1 (0x1), region = 71 }

</bundles_post_ra>
